<compile_context>
chip_gen: v7x
topology: tpu7x:2x2x1
jax: 0.10.0
libtpu: 0.0.40
codegen_flags: <defaults>
</compile_context>

<pallas_src>
import functools
import math

import jax
import jax.numpy as jnp
from jax.experimental import pallas as pl
from jax.experimental.pallas import tpu as pltpu

_LN_EPS = 1e-5                      # PyTorch nn.LayerNorm default eps
_INV_SQRT2 = 1.0 / math.sqrt(2.0)
_MIB = 1024 * 1024


# --------------------------------------------------------------------------- numerics
def _erf(x):
    """Abramowitz & Stegun 7.1.26 erf (max abs err ~1.5e-7) matching torch's erf-GELU.

    The divide is done as an EUP approximate reciprocal (separate bundle slot, nearly
    free) followed by one Newton step, so the VALU never sees a divide while accuracy
    stays at ~f32 level.
    """
    a1, a2, a3, a4, a5 = (
        0.254829592, -0.284496736, 1.421413741, -1.453152027, 1.061405429)
    p = 0.3275911
    sign = jnp.where(x >= 0.0, 1.0, -1.0)
    ax = jnp.abs(x)
    d = 1.0 + p * ax
    t = pl.reciprocal(d, approx=True)          # EUP
    t = t * (2.0 - d * t)                      # one Newton step -> ~f32 accuracy
    poly = ((((a5 * t + a4) * t + a3) * t + a2) * t + a1) * t
    return sign * (1.0 - poly * jnp.exp(-ax * ax))


def _gelu(h, approximate):
    if approximate:
        # tanh-form GELU: EUP tanh, cheapest on VALU-bound chips (small deviation vs erf).
        c = math.sqrt(2.0 / math.pi)
        return 0.5 * h * (1.0 + jnp.tanh(c * (h + 0.044715 * h * h * h)))
    return 0.5 * h * (1.0 + _erf(h * _INV_SQRT2))


def _layer_norm(v, gamma, beta):
    mu = jnp.mean(v, axis=-1, keepdims=True)
    vc = v - mu
    var = jnp.mean(vc * vc, axis=-1, keepdims=True)
    return vc * jax.lax.rsqrt(var + _LN_EPS) * gamma + beta


# --------------------------------------------------------------------------- kernel
def _ffn_kernel(x_ref, pd_ref, b1_ref, w1_ref, w2_ref, o_ref, xn_ref, acc_ref,
                *, approximate_gelu):
    # grid = (row tiles [parallel], hidden tiles [arbitrary, innermost])
    k = pl.program_id(1)

    @pl.when(k == 0)
    def _init():
        # LayerNorm(dim) once per row tile, cached in f32 scratch; zero the accumulator.
        pd = pd_ref[...].astype(jnp.float32)              # (8, dim) packed params
        x = x_ref[...].astype(jnp.float32)                # (tr, dim)
        xn_ref[...] = _layer_norm(x, pd[0:1, :], pd[1:2, :])
        acc_ref[...] = jnp.zeros_like(acc_ref)

    # ---- Linear(dim -> hidden chunk): native-dtype MXU operands, f32 accumulation ----
    h = jnp.dot(xn_ref[...].astype(w1_ref.dtype), w1_ref[...],
                preferred_element_type=jnp.float32)       # (tr, th)
    h = h + b1_ref[...].astype(jnp.float32)

    # ---- GELU (exact erf by default, as in PyTorch nn.GELU()) ----
    h = _gelu(h, approximate_gelu)

    # TODO(synk): nn.Dropout(p=0.2) is treated as inference-mode identity; training-mode
    # masking would need pltpu.prng_seed / prng_random_bits.

    # ---- Linear(hidden chunk -> dim), accumulated over hidden tiles ----
    acc_ref[...] += jnp.dot(h.astype(w2_ref.dtype), w2_ref[...],
                            preferred_element_type=jnp.float32)   # (tr, dim)

    @pl.when(k == pl.num_programs(1) - 1)
    def _finalize():
        pd = pd_ref[...].astype(jnp.float32)
        y = acc_ref[...] + pd[2:3, :]                     # + b2
        o_ref[...] = _layer_norm(y, pd[3:4, :], pd[4:5, :]).astype(o_ref.dtype)


# --------------------------------------------------------------------------- planning
def _vmem_capacity_bytes():
    try:
        cap = getattr(pltpu.get_tpu_info(), "vmem_capacity_bytes", None)
        if cap:
            return int(cap)
    except Exception:
        pass
    return 64 * _MIB                                       # conservative (v7x per-TC)


def _vmem_bytes(tr, dim, th, nh, x_itemsize, w_itemsize):
    """Accurate per-core VMEM estimate for a given plan (review: fixed arithmetic)."""
    wbuf = 1 if nh == 1 else 2                             # Buffered(1) when resident
    total = 0
    total += 2 * tr * dim * x_itemsize                     # x tile, double-buffered
    total += 2 * tr * dim * x_itemsize                     # out tile, double-buffered
    total += wbuf * 2 * dim * th * w_itemsize              # W1 + W2 chunks
    total += wbuf * th * 4 + 8 * dim * 4                   # b1 chunk + packed (8, dim) params
    total += 2 * tr * dim * 4                              # xn + acc f32 scratch
    total += tr * th * 4 + tr * th * w_itemsize            # f32 hidden chunk + MXU-dtype cast
    total += 2 * tr * dim * 4                              # LN temporaries / headroom
    return total


def _pick_row_tile(rows, block_rows):
    """Pick a row tile; prefer a multiple-of-8 divisor of rows so no wrapper-side pad."""
    if rows <= block_rows:
        return rows, rows
    lo = max(8, (block_rows // 4) // 8 * 8)
    cand = (block_rows // 8) * 8
    while cand >= lo:
        if cand % 8 == 0 and rows % cand == 0:
            return cand, rows
        cand -= 8
    tr = max(8, (block_rows // 8) * 8)
    rows_padded = ((rows + tr - 1) // tr) * tr
    return tr, rows_padded


def _pick_hidden_tile(dim, hidden, tr, x_itemsize, w_itemsize, vmem_cap, max_hidden_block):
    """Full hidden (resident weights) if it fits; otherwise tile hidden in 128-multiples."""
    budget = int(0.80 * vmem_cap)
    cands = [hidden]
    if hidden % 128 == 0:
        cands += [d for d in range(((hidden // 128) - 1) * 128, 0, -128) if hidden % d == 0]
    if max_hidden_block is not None:
        filt = [c for c in cands if c <= max_hidden_block]
        cands = filt if filt else [cands[-1]]
    for th in cands:
        if _vmem_bytes(tr, dim, th, hidden // th, x_itemsize, w_itemsize) <= budget:
            return th, hidden // th
    th = cands[-1]
    return th, hidden // th


# --------------------------------------------------------------------------- wrapper
def feed_forward(x, ln1_g, ln1_b, w1, b1, w2, b2, ln2_g, ln2_b, *,
                 block_rows=256, max_hidden_block=None,
                 approximate_gelu=False, cast_weights_to_bf16=False):
    """Pallas equivalent of FeedForward.forward(x) in eval mode.

    x:             (..., dim)
    w1:            (dim, hidden)   b1: (hidden,)    [weights in (in, out) layout]
    w2:            (hidden, dim)   b2: (dim,)
    ln*_g, ln*_b:  (dim,)
    """
    orig_shape = x.shape
    dim = orig_shape[-1]
    hidden = w1.shape[1]
    assert w1.shape == (dim, hidden) and w2.shape == (hidden, dim)

    if cast_weights_to_bf16:
        # bf16-native MXUs (v6e/v7x): ~3-4x matmul throughput, half the weight VMEM/DMA.
        w1 = w1.astype(jnp.bfloat16)
        w2 = w2.astype(jnp.bfloat16)

    xf = x.reshape(-1, dim)
    rows = xf.shape[0]
    x_itemsize = jnp.dtype(x.dtype).itemsize
    w_itemsize = jnp.dtype(w1.dtype).itemsize

    # ---- tiling plan ----
    tr, rows_padded = _pick_row_tile(rows, block_rows)
    if rows_padded != rows:
        # Benign: padded rows are all-zero; LN on them gives finite junk that is dropped.
        xf = jnp.pad(xf, ((0, rows_padded - rows), (0, 0)))
    vmem_cap = _vmem_capacity_bytes()
    th, nh = _pick_hidden_tile(dim, hidden, tr, x_itemsize, w_itemsize,
                               vmem_cap, max_hidden_block)
    resident = (nh == 1)

    est = _vmem_bytes(tr, dim, th, nh, x_itemsize, w_itemsize)
    vmem_limit = int(min(0.90 * vmem_cap, max(32 * _MIB, 1.25 * est)))

    # ---- pack the six tiny per-feature vectors into one (8, dim) slab + (1, hidden) ----
    pd = jnp.stack([ln1_g, ln1_b, b2, ln2_g, ln2_b]).astype(jnp.float32)   # (5, dim)
    pd = jnp.pad(pd, ((0, 3), (0, 0)))                                      # (8, dim)
    b1v = b1.reshape(1, hidden).astype(jnp.float32)

    # ---- BlockSpecs: constant-index blocks are single-buffered (DMA'd once) ----
    def _const_spec(shape):
        return pl.BlockSpec(shape, lambda i, k: (0, 0), pipeline_mode=pl.Buffered(1))

    pd_spec = _const_spec((8, dim))
    if resident:
        w1_spec = _const_spec((dim, th))
        w2_spec = _const_spec((th, dim))
        b1_spec = _const_spec((1, th))
    else:
        # Hidden-tiled fallback: weight chunks stream along the innermost grid axis.
        w1_spec = pl.BlockSpec((dim, th), lambda i, k: (0, k))
        w2_spec = pl.BlockSpec((th, dim), lambda i, k: (k, 0))
        b1_spec = pl.BlockSpec((1, th), lambda i, k: (0, k))

    kernel = functools.partial(_ffn_kernel, approximate_gelu=approximate_gelu)

    out = pl.pallas_call(
        kernel,
        out_shape=jax.ShapeDtypeStruct((rows_padded, dim), x.dtype),
        grid_spec=pltpu.PrefetchScalarGridSpec(
            num_scalar_prefetch=0,
            grid=(rows_padded // tr, nh),
            in_specs=[
                pl.BlockSpec((tr, dim), lambda i, k: (i, 0)),   # x tile
                pd_spec,                                        # packed LN/bias params
                b1_spec,                                        # b1 chunk
                w1_spec,                                        # W1 chunk
                w2_spec,                                        # W2 chunk
            ],
            out_specs=pl.BlockSpec((tr, dim), lambda i, k: (i, 0)),  # lane-dense output
            scratch_shapes=[
                pltpu.VMEM((tr, dim), jnp.float32),             # LN1(x) cache
                pltpu.VMEM((tr, dim), jnp.float32),             # f32 accumulator
            ],
        ),
        compiler_params=pltpu.CompilerParams(
            dimension_semantics=("parallel", "arbitrary"),
            vmem_limit_bytes=vmem_limit,
        ),
    )(xf, pd, b1v, w1, w2)

    if rows_padded != rows:
        out = out[:rows]
    return out.reshape(orig_shape)


# --------------------------------------------------------------------------- reference
def _reference_feed_forward(x, ln1_g, ln1_b, w1, b1, w2, b2, ln2_g, ln2_b):
    """Pure-JAX reference mirroring the PyTorch module (eval mode)."""
    def ln(v, g, b):
        mu = jnp.mean(v, axis=-1, keepdims=True)
        var = jnp.mean((v - mu) ** 2, axis=-1, keepdims=True)
        return (v - mu) * jax.lax.rsqrt(var + _LN_EPS) * g + b

    h = ln(x.astype(jnp.float32), ln1_g, ln1_b)
    h = jnp.dot(h, w1.astype(jnp.float32), precision=jax.lax.Precision.HIGHEST) + b1
    h = jax.nn.gelu(h, approximate=False)          # PyTorch nn.GELU() default (erf)
    h = jnp.dot(h, w2.astype(jnp.float32), precision=jax.lax.Precision.HIGHEST) + b2
    h = ln(h, ln2_g, ln2_b)
    return h.astype(x.dtype)


# --------------------------------------------------------------------------- test
if __name__ == "__main__":
    def _make_case(key, batch, seq, dim, hidden):
        ks = jax.random.split(key, 9)
        x = jax.random.normal(ks[0], (batch, seq, dim), dtype=jnp.float32)
        ln1_g = 1.0 + 0.1 * jax.random.normal(ks[1], (dim,), dtype=jnp.float32)
        ln1_b = 0.1 * jax.random.normal(ks[2], (dim,), dtype=jnp.float32)
        w1 = jax.random.normal(ks[3], (dim, hidden), dtype=jnp.float32) / math.sqrt(dim)
        b1 = 0.1 * jax.random.normal(ks[4], (hidden,), dtype=jnp.float32)
        w2 = jax.random.normal(ks[5], (hidden, dim), dtype=jnp.float32) / math.sqrt(hidden)
        b2 = 0.1 * jax.random.normal(ks[6], (dim,), dtype=jnp.float32)
        ln2_g = 1.0 + 0.1 * jax.random.normal(ks[7], (dim,), dtype=jnp.float32)
        ln2_b = 0.1 * jax.random.normal(ks[8], (dim,), dtype=jnp.float32)
        return (x, ln1_g, ln1_b, w1, b1, w2, b2, ln2_g, ln2_b)

    key = jax.random.PRNGKey(0)
    k_a, k_b = jax.random.split(key)

    # Case A: weights fully VMEM-resident (single hidden tile, single row tile).
    args_a = _make_case(k_a, 2, 8, 32, 64)
    out_a = jax.block_until_ready(feed_forward(*args_a))
    ref_a = _reference_feed_forward(*args_a)
    assert out_a.shape == args_a[0].shape
    err_a = float(jnp.max(jnp.abs(out_a - ref_a)))
    assert jnp.allclose(out_a, ref_a, rtol=2e-3, atol=2e-3), f"case A mismatch: {err_a}"

    # Case B: force the hidden-tiled accumulation path + multiple row tiles.
    args_b = _make_case(k_b, 2, 8, 128, 256)
    out_b = jax.block_until_ready(
        feed_forward(*args_b, block_rows=8, max_hidden_block=128))
    ref_b = _reference_feed_forward(*args_b)
    assert out_b.shape == args_b[0].shape
    err_b = float(jnp.max(jnp.abs(out_b - ref_b)))
    assert jnp.allclose(out_b, ref_b, rtol=2e-3, atol=2e-3), f"case B mismatch: {err_b}"

    print("KERNEL_OK")
</pallas_src>

<mosaic_0001>
module attributes {stable_mosaic.version = 11 : i64} {
  func.func @_ffn_kernel(%arg0: i32, %arg1: i32, %arg2: memref<16x32xf32, #tpu.memory_space<vmem>>, %arg3: memref<8x32xf32, #tpu.memory_space<vmem>>, %arg4: memref<1x64xf32, #tpu.memory_space<vmem>>, %arg5: memref<32x64xf32, #tpu.memory_space<vmem>>, %arg6: memref<64x32xf32, #tpu.memory_space<vmem>>, %arg7: memref<16x32xf32, #tpu.memory_space<vmem>>, %arg8: memref<16x32xf32, #tpu.memory_space<vmem>>, %arg9: memref<16x32xf32, #tpu.memory_space<vmem>>) attributes {dimension_semantics = [#tpu.dimension_semantics<parallel>, #tpu.dimension_semantics<arbitrary>], iteration_bounds = array<i64: 1, 1>, scalar_prefetch = 0 : i64, scratch_operands = 2 : i64, tpu.core_type = #tpu.core_type<tc>, window_params = [{transform_indices = @transform_0, window_bounds = array<i64: 16, 32>}, {pipeline_mode = #tpu.pipeline_mode<synchronous>, transform_indices = @transform_1, window_bounds = array<i64: 8, 32>}, {pipeline_mode = #tpu.pipeline_mode<synchronous>, transform_indices = @transform_2, window_bounds = array<i64: 1, 64>}, {pipeline_mode = #tpu.pipeline_mode<synchronous>, transform_indices = @transform_3, window_bounds = array<i64: 32, 64>}, {pipeline_mode = #tpu.pipeline_mode<synchronous>, transform_indices = @transform_4, window_bounds = array<i64: 64, 32>}, {transform_indices = @transform_5, window_bounds = array<i64: 16, 32>}]} {
    %c0_i32 = arith.constant 0 : i32
    %0 = arith.cmpi eq, %arg1, %c0_i32 : i32
    %1 = arith.extui %0 : i1 to i32
    %c0_i32_0 = arith.constant 0 : i32
    %2 = arith.cmpi ne, %1, %c0_i32_0 : i32
    scf.if %2 {
      %c0_31 = arith.constant 0 : index
      %c0_32 = arith.constant 0 : index
      %61 = vector.load %arg3[%c0_31, %c0_32] : memref<8x32xf32, #tpu.memory_space<vmem>>, vector<8x32xf32>
      %c0_33 = arith.constant 0 : index
      %c0_34 = arith.constant 0 : index
      %62 = vector.load %arg2[%c0_33, %c0_34] : memref<16x32xf32, #tpu.memory_space<vmem>>, vector<16x32xf32>
      %63 = vector.extract_strided_slice %61 {offsets = [0, 0], sizes = [1, 32], strides = [1, 1]} : vector<8x32xf32> to vector<1x32xf32>
      %64 = vector.extract_strided_slice %61 {offsets = [1, 0], sizes = [1, 32], strides = [1, 1]} : vector<8x32xf32> to vector<1x32xf32>
      %cst_35 = arith.constant dense<0.000000e+00> : vector<16xf32>
      %65 = vector.multi_reduction <add>, %62, %cst_35 [1] : vector<16x32xf32> to vector<16xf32>
      %66 = vector.shape_cast %65 : vector<16xf32> to vector<16x1xf32>
      %cst_36 = arith.constant 3.200000e+01 : f32
      %67 = vector.broadcast %cst_36 : f32 to vector<16x1xf32>
      %68 = arith.divf %66, %67 : vector<16x1xf32>
      %69 = vector.broadcast %68 : vector<16x1xf32> to vector<16x32xf32>
      %70 = arith.subf %62, %69 : vector<16x32xf32>
      %71 = arith.mulf %70, %70 : vector<16x32xf32>
      %cst_37 = arith.constant dense<0.000000e+00> : vector<16xf32>
      %72 = vector.multi_reduction <add>, %71, %cst_37 [1] : vector<16x32xf32> to vector<16xf32>
      %73 = vector.shape_cast %72 : vector<16xf32> to vector<16x1xf32>
      %cst_38 = arith.constant 3.200000e+01 : f32
      %74 = vector.broadcast %cst_38 : f32 to vector<16x1xf32>
      %75 = arith.divf %73, %74 : vector<16x1xf32>
      %cst_39 = arith.constant 9.99999974E-6 : f32
      %76 = vector.broadcast %cst_39 : f32 to vector<16x1xf32>
      %77 = arith.addf %75, %76 : vector<16x1xf32>
      %78 = math.rsqrt %77 : vector<16x1xf32>
      %79 = vector.broadcast %78 : vector<16x1xf32> to vector<16x32xf32>
      %80 = arith.mulf %70, %79 : vector<16x32xf32>
      %81 = vector.broadcast %63 : vector<1x32xf32> to vector<16x32xf32>
      %82 = arith.mulf %80, %81 : vector<16x32xf32>
      %83 = vector.broadcast %64 : vector<1x32xf32> to vector<16x32xf32>
      %84 = arith.addf %82, %83 : vector<16x32xf32>
      %c0_40 = arith.constant 0 : index
      %c0_41 = arith.constant 0 : index
      %85 = vector.load %arg8[%c0_40, %c0_41] : memref<16x32xf32, #tpu.memory_space<vmem>>, vector<16x32xf32>
      tpu.vector_store %arg8[%c0_40, %c0_41], %84 {strides = array<i32>} : memref<16x32xf32, #tpu.memory_space<vmem>>, vector<16x32xf32>,
      %cst_42 = arith.constant 0.000000e+00 : f32
      %86 = vector.broadcast %cst_42 : f32 to vector<16x32xf32>
      %c0_43 = arith.constant 0 : index
      %c0_44 = arith.constant 0 : index
      %87 = vector.load %arg9[%c0_43, %c0_44] : memref<16x32xf32, #tpu.memory_space<vmem>>, vector<16x32xf32>
      tpu.vector_store %arg9[%c0_43, %c0_44], %86 {strides = array<i32>} : memref<16x32xf32, #tpu.memory_space<vmem>>, vector<16x32xf32>,
    } else {
    }
    %c0 = arith.constant 0 : index
    %c0_1 = arith.constant 0 : index
    %3 = vector.load %arg8[%c0, %c0_1] : memref<16x32xf32, #tpu.memory_space<vmem>>, vector<16x32xf32>
    %c0_2 = arith.constant 0 : index
    %c0_3 = arith.constant 0 : index
    %4 = vector.load %arg5[%c0_2, %c0_3] : memref<32x64xf32, #tpu.memory_space<vmem>>, vector<32x64xf32>
    %cst = arith.constant dense<0.000000e+00> : vector<16x64xf32>
    %5 = tpu.matmul %3, %4, %cst {dimension_numbers = #tpu.dot_dimension_numbers<[1], [0], [0], [1], [0, 0, 1, 1], [], []>} : vector<16x32xf32>, vector<32x64xf32>, vector<16x64xf32> -> vector<16x64xf32>
    %c0_4 = arith.constant 0 : index
    %c0_5 = arith.constant 0 : index
    %6 = vector.load %arg4[%c0_4, %c0_5] : memref<1x64xf32, #tpu.memory_space<vmem>>, vector<1x64xf32>
    %7 = vector.broadcast %6 : vector<1x64xf32> to vector<16x64xf32>
    %8 = arith.addf %5, %7 : vector<16x64xf32>
    %cst_6 = arith.constant 5.000000e-01 : f32
    %9 = vector.broadcast %cst_6 : f32 to vector<16x64xf32>
    %10 = arith.mulf %9, %8 : vector<16x64xf32>
    %cst_7 = arith.constant 0.707106769 : f32
    %11 = vector.broadcast %cst_7 : f32 to vector<16x64xf32>
    %12 = arith.mulf %8, %11 : vector<16x64xf32>
    %cst_8 = arith.constant 0.000000e+00 : f32
    %13 = vector.broadcast %cst_8 : f32 to vector<16x64xf32>
    %14 = arith.cmpf oge, %12, %13 : vector<16x64xf32>
    %cst_9 = arith.constant 1.000000e+00 : f32
    %cst_10 = arith.constant -1.000000e+00 : f32
    %15 = vector.broadcast %cst_9 : f32 to vector<16x64xf32>
    %16 = vector.broadcast %cst_10 : f32 to vector<16x64xf32>
    %17 = arith.select %14, %15, %16 : vector<16x64xi1>, vector<16x64xf32>
    %18 = math.absf %12 : vector<16x64xf32>
    %cst_11 = arith.constant 0.327591091 : f32
    %19 = vector.broadcast %cst_11 : f32 to vector<16x64xf32>
    %20 = arith.mulf %19, %18 : vector<16x64xf32>
    %cst_12 = arith.constant 1.000000e+00 : f32
    %21 = vector.broadcast %cst_12 : f32 to vector<16x64xf32>
    %22 = arith.addf %21, %20 : vector<16x64xf32>
    %23 = tpu.reciprocal %22 {approx = true} : vector<16x64xf32> -> vector<16x64xf32>
    %24 = arith.mulf %22, %23 : vector<16x64xf32>
    %cst_13 = arith.constant 2.000000e+00 : f32
    %25 = vector.broadcast %cst_13 : f32 to vector<16x64xf32>
    %26 = arith.subf %25, %24 : vector<16x64xf32>
    %27 = arith.mulf %23, %26 : vector<16x64xf32>
    %cst_14 = arith.constant 1.06140542 : f32
    %28 = vector.broadcast %cst_14 : f32 to vector<16x64xf32>
    %29 = arith.mulf %28, %27 : vector<16x64xf32>
    %cst_15 = arith.constant -1.45315206 : f32
    %30 = vector.broadcast %cst_15 : f32 to vector<16x64xf32>
    %31 = arith.addf %29, %30 : vector<16x64xf32>
    %32 = arith.mulf %31, %27 : vector<16x64xf32>
    %cst_16 = arith.constant 1.42141378 : f32
    %33 = vector.broadcast %cst_16 : f32 to vector<16x64xf32>
    %34 = arith.addf %32, %33 : vector<16x64xf32>
    %35 = arith.mulf %34, %27 : vector<16x64xf32>
    %cst_17 = arith.constant -0.284496725 : f32
    %36 = vector.broadcast %cst_17 : f32 to vector<16x64xf32>
    %37 = arith.addf %35, %36 : vector<16x64xf32>
    %38 = arith.mulf %37, %27 : vector<16x64xf32>
    %cst_18 = arith.constant 0.254829586 : f32
    %39 = vector.broadcast %cst_18 : f32 to vector<16x64xf32>
    %40 = arith.addf %38, %39 : vector<16x64xf32>
    %41 = arith.mulf %40, %27 : vector<16x64xf32>
    %cst_19 = arith.constant 0.000000e+00 : f32
    %42 = vector.broadcast %cst_19 : f32 to vector<16x64xf32>
    %43 = arith.subf %42, %18 : vector<16x64xf32>
    %44 = arith.mulf %43, %18 : vector<16x64xf32>
    %45 = math.exp %44 : vector<16x64xf32>
    %46 = arith.mulf %41, %45 : vector<16x64xf32>
    %cst_20 = arith.constant 1.000000e+00 : f32
    %47 = vector.broadcast %cst_20 : f32 to vector<16x64xf32>
    %48 = arith.subf %47, %46 : vector<16x64xf32>
    %49 = arith.mulf %17, %48 : vector<16x64xf32>
    %cst_21 = arith.constant 1.000000e+00 : f32
    %50 = vector.broadcast %cst_21 : f32 to vector<16x64xf32>
    %51 = arith.addf %50, %49 : vector<16x64xf32>
    %52 = arith.mulf %10, %51 : vector<16x64xf32>
    %c0_22 = arith.constant 0 : index
    %c0_23 = arith.constant 0 : index
    %53 = vector.load %arg9[%c0_22, %c0_23] : memref<16x32xf32, #tpu.memory_space<vmem>>, vector<16x32xf32>
    %c0_24 = arith.constant 0 : index
    %c0_25 = arith.constant 0 : index
    %54 = vector.load %arg6[%c0_24, %c0_25] : memref<64x32xf32, #tpu.memory_space<vmem>>, vector<64x32xf32>
    %cst_26 = arith.constant dense<0.000000e+00> : vector<16x32xf32>
    %55 = tpu.matmul %52, %54, %cst_26 {dimension_numbers = #tpu.dot_dimension_numbers<[1], [0], [0], [1], [0, 0, 1, 1], [], []>} : vector<16x64xf32>, vector<64x32xf32>, vector<16x32xf32> -> vector<16x32xf32>
    %56 = arith.addf %53, %55 : vector<16x32xf32>
    %c0_27 = arith.constant 0 : index
    %c0_28 = arith.constant 0 : index
    %57 = vector.load %arg9[%c0_27, %c0_28] : memref<16x32xf32, #tpu.memory_space<vmem>>, vector<16x32xf32>
    tpu.vector_store %arg9[%c0_27, %c0_28], %56 {strides = array<i32>} : memref<16x32xf32, #tpu.memory_space<vmem>>, vector<16x32xf32>,
    %c0_i32_29 = arith.constant 0 : i32
    %58 = arith.cmpi eq, %arg1, %c0_i32_29 : i32
    %59 = arith.extui %58 : i1 to i32
    %c0_i32_30 = arith.constant 0 : i32
    %60 = arith.cmpi ne, %59, %c0_i32_30 : i32
    scf.if %60 {
      %c0_31 = arith.constant 0 : index
      %c0_32 = arith.constant 0 : index
      %61 = vector.load %arg3[%c0_31, %c0_32] : memref<8x32xf32, #tpu.memory_space<vmem>>, vector<8x32xf32>
      %c0_33 = arith.constant 0 : index
      %c0_34 = arith.constant 0 : index
      %62 = vector.load %arg9[%c0_33, %c0_34] : memref<16x32xf32, #tpu.memory_space<vmem>>, vector<16x32xf32>
      %63 = vector.extract_strided_slice %61 {offsets = [2, 0], sizes = [1, 32], strides = [1, 1]} : vector<8x32xf32> to vector<1x32xf32>
      %64 = vector.broadcast %63 : vector<1x32xf32> to vector<16x32xf32>
      %65 = arith.addf %62, %64 : vector<16x32xf32>
      %66 = vector.extract_strided_slice %61 {offsets = [3, 0], sizes = [1, 32], strides = [1, 1]} : vector<8x32xf32> to vector<1x32xf32>
      %67 = vector.extract_strided_slice %61 {offsets = [4, 0], sizes = [1, 32], strides = [1, 1]} : vector<8x32xf32> to vector<1x32xf32>
      %cst_35 = arith.constant dense<0.000000e+00> : vector<16xf32>
      %68 = vector.multi_reduction <add>, %65, %cst_35 [1] : vector<16x32xf32> to vector<16xf32>
      %69 = vector.shape_cast %68 : vector<16xf32> to vector<16x1xf32>
      %cst_36 = arith.constant 3.200000e+01 : f32
      %70 = vector.broadcast %cst_36 : f32 to vector<16x1xf32>
      %71 = arith.divf %69, %70 : vector<16x1xf32>
      %72 = vector.broadcast %71 : vector<16x1xf32> to vector<16x32xf32>
      %73 = arith.subf %65, %72 : vector<16x32xf32>
      %74 = arith.mulf %73, %73 : vector<16x32xf32>
      %cst_37 = arith.constant dense<0.000000e+00> : vector<16xf32>
      %75 = vector.multi_reduction <add>, %74, %cst_37 [1] : vector<16x32xf32> to vector<16xf32>
      %76 = vector.shape_cast %75 : vector<16xf32> to vector<16x1xf32>
      %cst_38 = arith.constant 3.200000e+01 : f32
      %77 = vector.broadcast %cst_38 : f32 to vector<16x1xf32>
      %78 = arith.divf %76, %77 : vector<16x1xf32>
      %cst_39 = arith.constant 9.99999974E-6 : f32
      %79 = vector.broadcast %cst_39 : f32 to vector<16x1xf32>
      %80 = arith.addf %78, %79 : vector<16x1xf32>
      %81 = math.rsqrt %80 : vector<16x1xf32>
      %82 = vector.broadcast %81 : vector<16x1xf32> to vector<16x32xf32>
      %83 = arith.mulf %73, %82 : vector<16x32xf32>
      %84 = vector.broadcast %66 : vector<1x32xf32> to vector<16x32xf32>
      %85 = arith.mulf %83, %84 : vector<16x32xf32>
      %86 = vector.broadcast %67 : vector<1x32xf32> to vector<16x32xf32>
      %87 = arith.addf %85, %86 : vector<16x32xf32>
      %c0_40 = arith.constant 0 : index
      %c0_41 = arith.constant 0 : index
      %88 = vector.load %arg7[%c0_40, %c0_41] : memref<16x32xf32, #tpu.memory_space<vmem>>, vector<16x32xf32>
      tpu.vector_store %arg7[%c0_40, %c0_41], %87 {strides = array<i32>} : memref<16x32xf32, #tpu.memory_space<vmem>>, vector<16x32xf32>,
    } else {
    }
    return
  }
  func.func @transform_0(%arg0: i32, %arg1: i32) -> (i32, i32) {
    %c0_i32 = arith.constant 0 : i32
    %c0_i32_0 = arith.constant 0 : i32
    return %arg0, %c0_i32 : i32, i32
  }
  func.func @transform_1(%arg0: i32, %arg1: i32) -> (i32, i32) {
    %c0_i32 = arith.constant 0 : i32
    %c0_i32_0 = arith.constant 0 : i32
    %c0_i32_1 = arith.constant 0 : i32
    return %c0_i32, %c0_i32_0 : i32, i32
  }
  func.func @transform_2(%arg0: i32, %arg1: i32) -> (i32, i32) {
    %c0_i32 = arith.constant 0 : i32
    %c0_i32_0 = arith.constant 0 : i32
    %c0_i32_1 = arith.constant 0 : i32
    return %c0_i32, %c0_i32_0 : i32, i32
  }
  func.func @transform_3(%arg0: i32, %arg1: i32) -> (i32, i32) {
    %c0_i32 = arith.constant 0 : i32
    %c0_i32_0 = arith.constant 0 : i32
    %c0_i32_1 = arith.constant 0 : i32
    return %c0_i32, %c0_i32_0 : i32, i32
  }
  func.func @transform_4(%arg0: i32, %arg1: i32) -> (i32, i32) {
    %c0_i32 = arith.constant 0 : i32
    %c0_i32_0 = arith.constant 0 : i32
    %c0_i32_1 = arith.constant 0 : i32
    return %c0_i32, %c0_i32_0 : i32, i32
  }
  func.func @transform_5(%arg0: i32, %arg1: i32) -> (i32, i32) {
    %c0_i32 = arith.constant 0 : i32
    %c0_i32_0 = arith.constant 0 : i32
    return %arg0, %c0_i32 : i32, i32
  }
}

</mosaic_0001>

<bundles_post_ra>
// kernel: tpu_custom_call.1
= control target key start
LH: loop header
LB: loop body
LE: loop exit
PB: predicated region body
PF: predicated region fallthrough
CT: control target
= control target key end

     0   :  { %vm28_vm0 = vcmask 261120   ;;  %s637_s0 = inlined_call_operand.vmem [shape: f32[16,32], index: 0, kind: input, shape index: {}]   ;;  %s638_s1 = inlined_call_operand.vmem [shape: f32[8,32], index: 1, kind: input, shape index: {}]   ;;  %s639_s2 = inlined_call_operand.vmem [shape: f32[1,64], index: 2, kind: input, shape index: {}]   ;;  %s640_s3 = inlined_call_operand.vmem [shape: f32[32,64], index: 3, kind: input, shape index: {}]   ;;  %s641_s4 = inlined_call_operand.vmem [shape: f32[64,32], index: 4, kind: input, shape index: {}]   ;;  %s642_s5 = inlined_call_operand.hbm [shape: f32[16,32], index: 5, kind: output, shape index: {}]  }
   0x1   :  { %v26_v0 = vld [vmem:[%s637_s0] sm:$0xff]  ;;  %v27_v1 = vld [vmem:[%s637_s0 + $0x8] sm:$0xff] }
   0x2   :  { %10 = vsyncpa [#allocation5], 0  ;;  %v29_v2 = vsel %vm28_vm0, %v26_v0, 0.0  ;;  %v32_v3 = vsel %vm28_vm0, %v27_v1, 0.0  ;;  %v74_v14 = vld [vmem:[%s640_s3] sm:$0xff]  ;;  %v75_v15 = vld [vmem:[%s640_s3 + $0x8] sm:$0xff]  ;;  %v56_v22 = vlaneseq }
   0x3   :  { %30 = vadd.xlane.f32.xlu0 %v29_v2  ;;  %v441_v16 = vpack.c.bf16 %v75_v15, %v74_v14  ;;  %v76_v17 = vld [vmem:[%s640_s3 + $0x10] sm:$0xff]  ;;  %v77_v18 = vld [vmem:[%s640_s3 + $0x18] sm:$0xff]  ;;  %v573_v29 = vld [vmem:[%s638_s1] sm:$0xff]  ;;  %v510_v55 = vmov 0.0   ;;  %vm235_vm3 = vcmask 523264  }
   0x4   :  { %v445_v19 = vpack.c.bf16 %v77_v18, %v76_v17  ;;  %v567_v26 = vshrl.u32 %v56_v22, 7  ;;  %v227_v43 = vld [vmem:[%s641_s4] sm:$0xff]  ;;  %v228_v44 = vld [vmem:[%s641_s4 + $0x8] sm:$0xff]  ;;  %v229_v46 = vld [vmem:[%s641_s4 + $0x10] sm:$0xff]  ;;  %71 = vst.msk [vmem:[#allocation3 + $0x8] sm:$0xff] %vm28_vm0, %v510_v55 }
   0x5   :  { %442 = vmatprep.subr.bf16.mxu0 %v441_v16  ;;  %v449_v45 = vpack.c.bf16 %v228_v44, %v227_v43  ;;  %v230_v47 = vld [vmem:[%s641_s4 + $0x18] sm:$0xff]  ;;  %v231_v49 = vld [vmem:[%s641_s4 + $0x20] sm:$0xff]  ;;  %v232_v50 = vld [vmem:[%s641_s4 + $0x28] sm:$0xff]  ;;  %70 = vst.msk [vmem:[#allocation3] sm:$0xff] %vm28_vm0, %v510_v55  ;;  %v511_v44 = vmov -1.0  }
   0x6   :  { %444 = vmatpush3.bf16.msra.mxu0 %v441_v16  ;;  %v58_v28 = vsub.s32 0, %v567_v26  ;;  %v64_v30 = vsub.s32 1, %v567_v26  ;;  %v453_v48 = vpack.c.bf16 %v230_v47, %v229_v46  ;;  %v457_v51 = vpack.c.bf16 %v232_v50, %v231_v49  ;;  %v233_v52 = vld [vmem:[%s641_s4 + $0x30] sm:$0xff]  ;;  %v234_v53 = vld [vmem:[%s641_s4 + $0x38] sm:$0xff]  ;;  %v390_v56 = vld [vmem:[%s639_s2] ss:$0 sm:$0xff] }
   0x7   :  { %33 = vadd.xlane.f32.xlu0 %v32_v3  ;;  %446 = vmatprep.subr.bf16.mxu0 %v445_v19  ;;  %v461_v54 = vpack.c.bf16 %v234_v53, %v233_v52  ;;  %s512_s2 = smov [#allocation4]  }
   0x8   :  { %v59_v31 = vrot.slane %v573_v29, %v58_v28  ;;  %v65_v34 = vrot.slane %v573_v29, %v64_v30  ;;  %450 = vmatprep.subr.bf16.mxu1 %v449_v45  ;;  %s379_s4 = sshll.u32 %s512_s2, 4  ;;  %s380_s4 = int_to_ptr.vmem [resolvable:$true] %s379_s4 }
   0x9   :  { %452 = vmatpush3.bf16.msra.mxu1 %v449_v45  ;;  %s486_s0 = scalar_lea.vmem %s380_s4, 256  ;;  %p491_p1 = scmp.lt.s32.totalorder %s380_s4, %s380_s4 }
   0xa   :  { %448 = vmatpush3.bf16.msra.mxu0 %v445_v19  ;;  %454 = vmatprep.subr.bf16.mxu1 %v453_v48  ;;  %p487_p0 = scmp.ne.s32.totalorder %s380_s4, %s486_s0  ;;  %p492_p2 = scmp.lt.s32.totalorder %s486_s0, %s486_s0 }
   0xc   :  { %p493_p3 = por %p492_p2, %p491_p1 }
   0xd   :  { %456 = vmatpush3.bf16.msra.mxu1 %v453_v48 }
   0xe   :  { %458 = vmatprep.subr.bf16.mxu1 %v457_v51  ;;  %p494_p4 = pnand %p493_p3, %p487_p0 }
  0x11   :  { %460 = vmatpush3.bf16.msra.mxu1 %v457_v51 }
  0x12   :  { %462 = vmatprep.subr.bf16.mxu1 %v461_v54 }
  0x15   :  { %464 = vmatpush3.bf16.msra.mxu1 %v461_v54 }
  0x90   :  { %v31_v4 = vpop.xlane.xlu0 %30 }
  0x91   :  { %v36_v5 = vmul.f32 0.03125, %v31_v4 }
  0x93   :  { %v38_v6 = vsub.f32 %v26_v0, %v36_v5 }
  0x94   :  { %v34_v7 = vpop.xlane.xlu0 %33 }
  0x95   :  { %v37_v8 = vmul.f32 0.03125, %v34_v7  ;;  %v40_v9 = vmul.f32 %v38_v6, %v38_v6 }
  0x97   :  { %v39_v10 = vsub.f32 %v27_v1, %v37_v8  ;;  %v42_v11 = vsel %vm28_vm0, %v40_v9, 0.0 }
  0x98   :  { %43 = vadd.xlane.f32.xlu1 %v42_v11 }
  0x99   :  { %v41_v12 = vmul.f32 %v39_v10, %v39_v10 }
  0x9b   :  { %v45_v13 = vsel %vm28_vm0, %v41_v12, 0.0 }
  0x9c   :  { %46 = vadd.xlane.f32.xlu1 %v45_v13 }
 0x125   :  { %v44_v20 = vpop.xlane.xlu1 %43 }
 0x126   :  { %v48_v21 = vmul.f32 0.03125, %v44_v20 }
 0x128   :  { %v50_v23 = vadd.f32 1e-05, %v48_v21 }
 0x129   :  { %v47_v24 = vpop.xlane.xlu1 %46 }
 0x12a   :  { %470 = vrsqrt.f32 %v50_v23  ;;  %v49_v25 = vmul.f32 0.03125, %v47_v24 }
 0x12c   :  { %v51_v27 = vadd.f32 1e-05, %v49_v25 }
 0x12e   :  { %472 = vrsqrt.f32 %v51_v27 }
 0x134   :  { %v471_v32 = vpop.eup %470 }
 0x135   :  { %v54_v33 = vmul.f32 %v471_v32, %v38_v6 }
 0x137   :  { %v60_v35 = vmul.f32 %v59_v31, %v54_v33 }
 0x138   :  { %v473_v36 = vpop.eup %472 }
 0x139   :  { %v66_v37 = vadd.f32 %v65_v34, %v60_v35  ;;  %v55_v38 = vmul.f32 %v473_v36, %v39_v10 }
 0x13b   :  { %68 = vst.msk [vmem:[#allocation2] sm:$0xff] %vm28_vm0, %v66_v37  ;;  %v61_v39 = vmul.f32 %v59_v31, %v55_v38 }
 0x13d   :  { %v67_v40 = vadd.f32 %v65_v34, %v61_v39 }
 0x13f   :  { %69 = vst.msk [vmem:[#allocation2 + $0x8] sm:$0xff] %vm28_vm0, %v67_v40 }
 0x142   :  { %v72_v41 = vld [vmem:[#allocation2] sm:$0xff] }
 0x143   :  { %419 = vmatprep.mubr.msk.f32.mxu0 %vm28_vm0, %v72_v41 }
 0x146   :  { %v73_v42 = vld [vmem:[#allocation2 + $0x8] sm:$0xff] }
 0x147   :  { %420 = vmatmul.mubr.msk.f32.vlgmr.msra.gmra.mrb[0].mxu0 %vm28_vm0, %v73_v42 }
 0x21a   :  { %v421_v57 = vpop.f32.mrb[0].mxu0 }
 0x21b   :  { %v164_v58 = vadd.f32 %v421_v57, %v390_v56  ;;  %v158_v59 = vpop.f32.mrb[1].mxu0  ;;  %v225_v57 = vld [vmem:[#allocation3] sm:$0xff] }
 0x21c   :  { %v159_v60 = vadd.f32 %v390_v56, %v158_v59  ;;  %v226_v56 = vld [vmem:[#allocation3 + $0x8] sm:$0xff] }
 0x21d   :  { %v170_v61 = vmul.f32 0.70710677, %v164_v58  ;;  %v168_v53 = vmul.f32 0.5, %v164_v58 }
 0x21e   :  { %v169_v62 = vmul.f32 0.70710677, %v159_v60  ;;  %v167_v51 = vmul.f32 0.5, %v159_v60 }
 0x21f   :  { %v176_v63 = vand.u32 2147483647, %v170_v61  ;;  %vm172_vm1 = vcmp.ge.f32.partialorder %v170_v61, 0.0 }
 0x220   :  { %v175_v0 = vand.u32 2147483647, %v169_v62  ;;  %vm171_vm2 = vcmp.ge.f32.partialorder %v169_v62, 0.0  ;;  %v174_v45 = vsel %vm172_vm1, 1.0, %v511_v44 }
 0x221   :  { %v178_v1 = vmul.f32 0.3275911, %v176_v63  ;;  %v208_v8 = vsub.f32 0.0, %v176_v63  ;;  %v173_v48 = vsel %vm171_vm2, 1.0, %v511_v44 }
 0x222   :  { %v177_v2 = vmul.f32 0.3275911, %v175_v0  ;;  %v207_v11 = vsub.f32 0.0, %v175_v0 }
 0x223   :  { %v180_v3 = vadd.f32 1.0, %v178_v1  ;;  %v210_v14 = vmul.f32 %v208_v8, %v176_v63 }
 0x224   :  { %v179_v4 = vadd.f32 1.0, %v177_v2  ;;  %v209_v17 = vmul.f32 %v207_v11, %v175_v0  ;;  %v329_v0 = vsub.s32 2, %v567_v26 }
 0x225   :  { %474 = vrcp.f32 %v180_v3  ;;  %v213_v20 = vmul.f32 1.442695, %v210_v14 }
 0x226   :  { %476 = vrcp.f32 %v179_v4  ;;  %v211_v23 = vmul.f32 1.442695, %v209_v17  ;;  %v330_v60 = vrot.slane %v573_v29, %v329_v0 }
 0x227   :  { %478 = vpow2.f32 %v213_v20 }
 0x228   :  { %480 = vpow2.f32 %v211_v23  ;;  %v368_v23 = vsub.s32 4, %v567_v26 }
 0x22f   :  { %v475_v5 = vpop.eup %474 }
 0x230   :  { %v477_v6 = vpop.eup %476  ;;  %v184_v7 = vmul.f32 %v475_v5, %v180_v3 }
 0x231   :  { %v183_v9 = vmul.f32 %v477_v6, %v179_v4  ;;  %v479_v38 = vpop.eup %478 }
 0x232   :  { %v186_v10 = vsub.f32 2.0, %v184_v7  ;;  %v481_v40 = vpop.eup %480 }
 0x233   :  { %v185_v12 = vsub.f32 2.0, %v183_v9 }
 0x234   :  { %v188_v13 = vmul.f32 %v475_v5, %v186_v10 }
 0x235   :  { %v187_v15 = vmul.f32 %v477_v6, %v185_v12 }
 0x236   :  { %v190_v16 = vmul.f32 1.0614054, %v188_v13 }
 0x237   :  { %v189_v18 = vmul.f32 1.0614054, %v187_v15 }
 0x238   :  { %v192_v19 = vadd.f32 -1.4531521, %v190_v16 }
 0x239   :  { %v191_v21 = vadd.f32 -1.4531521, %v189_v18 }
 0x23a   :  { %v194_v22 = vmul.f32 %v192_v19, %v188_v13 }
 0x23b   :  { %v193_v24 = vmul.f32 %v191_v21, %v187_v15 }
 0x23c   :  { %v196_v25 = vadd.f32 1.4214138, %v194_v22  ;;  %v362_v22 = vsub.s32 3, %v567_v26 }
 0x23d   :  { %v195_v27 = vadd.f32 1.4214138, %v193_v24 }
 0x23e   :  { %v198_v28 = vmul.f32 %v196_v25, %v188_v13  ;;  %v363_v24 = vrot.slane %v573_v29, %v362_v22 }
 0x23f   :  { %v197_v30 = vmul.f32 %v195_v27, %v187_v15 }
 0x240   :  { %v200_v31 = vadd.f32 -0.28449672, %v198_v28  ;;  %v369_v28 = vrot.slane %v573_v29, %v368_v23 }
 0x241   :  { %v199_v32 = vadd.f32 -0.28449672, %v197_v30 }
 0x242   :  { %v202_v33 = vmul.f32 %v200_v31, %v188_v13 }
 0x243   :  { %v201_v34 = vmul.f32 %v199_v32, %v187_v15 }
 0x244   :  { %v204_v35 = vadd.f32 0.2548296, %v202_v33 }
 0x245   :  { %v203_v36 = vadd.f32 0.2548296, %v201_v34 }
 0x246   :  { %v206_v37 = vmul.f32 %v204_v35, %v188_v13 }
 0x247   :  { %v205_v39 = vmul.f32 %v203_v36, %v187_v15 }
 0x248   :  { %v216_v41 = vmul.f32 %v479_v38, %v206_v37 }
 0x249   :  { %v215_v42 = vmul.f32 %v481_v40, %v205_v39 }
 0x24a   :  { %v218_v43 = vsub.f32 1.0, %v216_v41 }
 0x24b   :  { %v217_v46 = vsub.f32 1.0, %v215_v42 }
 0x24c   :  { %v220_v47 = vmul.f32 %v218_v43, %v174_v45 }
 0x24d   :  { %v219_v49 = vmul.f32 %v217_v46, %v173_v48 }
 0x24e   :  { %v222_v50 = vadd.f32 1.0, %v220_v47 }
 0x24f   :  { %v221_v52 = vadd.f32 1.0, %v219_v49 }
 0x250   :  { %v224_v55 = vmul.f32 %v222_v50, %v168_v53 }
 0x251   :  { %v223_v54 = vmul.f32 %v221_v52, %v167_v51 }
 0x253   :  { %438 = vmatprep.mubr.msk.f32.mxu1 %vm235_vm3, %v223_v54 }
 0x254   :  { %439 = vmatmul.mubr.msk.f32.vlgmr.msra.gmra.mrb[0].mxu1 %vm235_vm3, %v224_v55 }
 0x327   :  { %v440_v59 = vpop.f32.mrb[0].mxu1 }
 0x328   :  { %v318_v61 = vadd.f32 %v440_v59, %v226_v56  ;;  %v308_v62 = vpop.f32.mrb[1].mxu1 }
 0x329   :  { %v317_v63 = vadd.f32 %v308_v62, %v225_v57 }
 0x32a   :  { %320 = vst.msk [vmem:[#allocation3 + $0x8] sm:$0xff] %vm28_vm0, %v318_v61 }
 0x32b   :  { %319 = vst.msk [vmem:[#allocation3] sm:$0xff] %vm28_vm0, %v317_v63 }
 0x331   :  { %v326_v58 = vld [vmem:[#allocation3 + $0x8] sm:$0xff] }
 0x332   :  { %v332_v1 = vadd.f32 %v330_v60, %v326_v58  ;;  %v325_v2 = vld [vmem:[#allocation3] sm:$0xff] }
 0x333   :  { %v331_v3 = vadd.f32 %v330_v60, %v325_v2 }
 0x334   :  { %v336_v4 = vsel %vm28_vm0, %v332_v1, 0.0 }
 0x335   :  { %337 = vadd.xlane.f32.xlu1 %v336_v4  ;;  %v333_v5 = vsel %vm28_vm0, %v331_v3, 0.0 }
 0x336   :  { %334 = vadd.xlane.f32.xlu0 %v333_v5 }
 0x3c2   :  { %v338_v6 = vpop.xlane.xlu1 %337 }
 0x3c3   :  { %v341_v7 = vmul.f32 0.03125, %v338_v6  ;;  %v335_v8 = vpop.xlane.xlu0 %334 }
 0x3c4   :  { %v340_v9 = vmul.f32 0.03125, %v335_v8 }
 0x3c5   :  { %v343_v10 = vsub.f32 %v332_v1, %v341_v7 }
 0x3c6   :  { %v342_v11 = vsub.f32 %v331_v3, %v340_v9 }
 0x3c7   :  { %v345_v12 = vmul.f32 %v343_v10, %v343_v10 }
 0x3c8   :  { %v344_v13 = vmul.f32 %v342_v11, %v342_v11 }
 0x3c9   :  { %v349_v14 = vsel %vm28_vm0, %v345_v12, 0.0 }
 0x3ca   :  { %350 = vadd.xlane.f32.xlu1 %v349_v14  ;;  %v346_v15 = vsel %vm28_vm0, %v344_v13, 0.0 }
 0x3cb   :  { %347 = vadd.xlane.f32.xlu0 %v346_v15 }
 0x457   :  { %v351_v16 = vpop.xlane.xlu1 %350 }
 0x458   :  { %v353_v17 = vmul.f32 0.03125, %v351_v16  ;;  %v348_v18 = vpop.xlane.xlu0 %347 }
 0x459   :  { %v352_v19 = vmul.f32 0.03125, %v348_v18 }
 0x45a   :  { %v355_v20 = vadd.f32 1e-05, %v353_v17 }
 0x45b   :  { %v354_v21 = vadd.f32 1e-05, %v352_v19 }
 0x45c   :  { %482 = vrsqrt.f32 %v355_v20 }
 0x45d   :  { %484 = vrsqrt.f32 %v354_v21 }
 0x466   :  { %v483_v25 = vpop.eup %482 }
 0x467   :  { %v485_v27 = vpop.eup %484  ;;  %v359_v30 = vmul.f32 %v483_v25, %v343_v10 }
 0x468   :  { %v358_v31 = vmul.f32 %v485_v27, %v342_v11 }
 0x469   :  { %v365_v32 = vmul.f32 %v363_v24, %v359_v30 }
 0x46a   :  { %v364_v33 = vmul.f32 %v363_v24, %v358_v31 }
 0x46b   :  { %v371_v34 = vadd.f32 %v369_v28, %v365_v32 }
 0x46c   :  { %v370_v35 = vadd.f32 %v369_v28, %v364_v33 }
 0x46d   :  { %373 = vst.msk [vmem:[#allocation4 + $0x8] sm:$0xff] %vm28_vm0, %v371_v34 }
 0x46e   :  { %372 = vst.msk [vmem:[#allocation4] sm:$0xff] %vm28_vm0, %v370_v35 }
 0x46f   :  { %497 = shalt.err (!%p494_p4)
}
 0x470   :  { %s498_s24 = scalar_lea.hbm %s642_s5, 256 }
 0x471   :  { %p499_p5 = scmp.ne.s32.totalorder %s642_s5, %s498_s24  ;;  %p502_p6 = scmp.lt.u32.totalorder %s498_s24, %s642_s5 }
 0x473   :  { %p504_p7 = pnand %p502_p6, %p499_p5 }
 0x475   :  { %507 = shalt.err (!%p504_p7)
}
 0x476   :  { %s513_s29 = smov 128   ;;  %s514_s30 = smov 8  }
 0x477   :  { %385 = dma.vmem_to_hbm [thread:$0]  %s380_s4, 256, %s642_s5, [#allocation5], %s513_s29, %s513_s29, %s514_s30  }
 0x478   :  { %508 = dma.done.wait [#allocation5], 256  }
 0x479   :  { %509 = vsyncadd [#allocation5], 4294967040 }
 0x47a   :  { %389 = vsyncpa [#allocation5], 1 }

</bundles_post_ra>
